<compile_context>
chip_gen: v7x
topology: tpu7x:2x2x1
jax: 0.10.0
libtpu: 0.0.40
codegen_flags: <defaults>
</compile_context>

<pallas_src>
import math
import functools

import jax
import jax.numpy as jnp
from jax.experimental import pallas as pl
from jax.experimental.pallas import tpu as pltpu


def _mha_kernel(x_ref, wqkv_ref, wo_ref, bo_ref, out_ref, *, n_head, c):
    """Fused QKV projection + per-head softmax attention + fused output
    projection for a block of `bt` batch elements."""
    bt, S, c_in = x_ref.shape
    M = bt * S
    Hc = n_head * c

    # f32 tile DMA'd in, cast to bf16 on the VPU (free vs. an extra HBM pass).
    x2 = x_ref[...].reshape(M, c_in).astype(jnp.bfloat16)

    # (1) Fused QKV projection: one lane-dense MXU matmul with N = 3*H*c.
    #     1/sqrt(c) is pre-folded into the Q columns of W_qkv.
    qkv = jnp.dot(x2, wqkv_ref[...],
                  preferred_element_type=jnp.float32)          # (M, 3*Hc) f32

    # (2) Per-head views for the attention contractions.  The Python loop only
    #     does relayout (static lane slices + leading-dim stack); every matmul
    #     below remains batched over all (head, batch) pairs.
    def split_heads(col0):
        parts = [
            qkv[:, col0 + h * c: col0 + (h + 1) * c].reshape(1, bt, S, c)
            for h in range(n_head)
        ]
        return (jnp.concatenate(parts, axis=0)
                .reshape(n_head * bt, S, c)
                .astype(jnp.bfloat16))

    q = split_heads(0)            # (H*bt, S, c) bf16, scale already applied
    k = split_heads(Hc)
    v = split_heads(2 * Hc)

    # (3) Scores + numerically-stable softmax in f32; reciprocal on the EUP.
    s = jnp.einsum('bqc,bkc->bqk', q, k,
                   preferred_element_type=jnp.float32)         # (H*bt, S, S)
    s = s - jnp.max(s, axis=-1, keepdims=True)
    p = jnp.exp(s)
    p = p * pl.reciprocal(jnp.sum(p, axis=-1, keepdims=True), approx=True)

    # (4) Weighted values, then merge heads back onto lanes (head-major order,
    #     matching the nn.Linear column split expected by W_o).
    o = jnp.einsum('bqk,bkc->bqc', p.astype(jnp.bfloat16), v,
                   preferred_element_type=jnp.float32)         # (H*bt, S, c)
    o = o.reshape(n_head, bt, S, c)
    o = jnp.concatenate([o[h] for h in range(n_head)], axis=-1)  # (bt, S, Hc)
    o = o.reshape(M, Hc).astype(jnp.bfloat16)

    # (5) Fused output projection: one (M, H*c) x (H*c, c_in) MXU matmul.
    out = jnp.dot(o, wo_ref[...],
                  preferred_element_type=jnp.float32) + bo_ref[...]   # (M, c_in)
    out_ref[...] = out.reshape(bt, S, c_in).astype(out_ref.dtype)


def _pick_block_b(batch, seq, target_rows=512):
    """Largest divisor of `batch` with block_b*seq <= target_rows, capped at
    batch//2 so the 'parallel' grid axis always has >= 2 steps (keeps both
    v7x TensorCores busy; one extra ~0.35 us step on single-TC v5e/v6e)."""
    cap = max(1, batch // 2) if batch >= 2 else 1
    best = 1
    for d in range(1, cap + 1):
        if batch % d == 0 and d * seq <= target_rows:
            best = d
    return best


def _vmem_limit_bytes(block_b, S, c_in, n_head, c):
    """Right-size the scoped VMEM request to the working set (x/out blocks
    double-buffered, weights double-buffered, live intermediates) with a
    generous margin, clamped under v7x's 64 MiB physical VMEM."""
    Hc = n_head * c
    M = block_b * S
    io = 2 * (M * c_in * 4 + M * c_in * 4)                       # x + out blocks
    w = 2 * (c_in * 3 * Hc * 2 + Hc * c_in * 2 + c_in * 4)       # weights + bias
    inter = (M * 3 * Hc * 4                                      # qkv f32
             + 3 * n_head * M * c * 2                            # q/k/v bf16
             + 2 * n_head * block_b * S * S * 4                  # scores + probs f32
             + n_head * M * c * 4 + M * Hc * 2                   # o f32 / bf16
             + M * c_in * 4)                                     # out f32
    est = io + w + inter
    return int(min(max(4 * est, 32 * 1024 * 1024), 48 * 1024 * 1024))


def prepare_params(params, *, n_head, c):
    """One-time transform of module parameters into the kernel-ready layout:
    W_q/W_k/W_v fused into one bf16 (c_in, 3*H*c) matrix with 1/sqrt(c)
    folded into the Q columns; W_o kept flat (H*c, c_in) in bf16."""
    scale = 1.0 / math.sqrt(c)
    wqkv = jnp.concatenate(
        [params["wq"] * scale, params["wk"], params["wv"]], axis=1)
    return {
        "wqkv": wqkv.astype(jnp.bfloat16),            # (c_in, 3*H*c)
        "wo": params["wo"].astype(jnp.bfloat16),      # (H*c, c_in)
        "bo": params["bo"].astype(jnp.float32),       # (1, c_in)
    }


def multi_head_attention(x, prep, *, n_head, c, block_b=None):
    """x: (B, S, c_in) float32; prep: output of prepare_params.
    Returns (B, S, c_in) float32."""
    B, S, c_in = x.shape
    Hc = n_head * c
    if block_b is None:
        block_b = _pick_block_b(B, S)
    assert B % block_b == 0
    grid = (B // block_b,)

    kernel = functools.partial(_mha_kernel, n_head=n_head, c=c)
    out = pl.pallas_call(
        kernel,
        out_shape=jax.ShapeDtypeStruct((B, S, c_in), jnp.float32),
        grid_spec=pltpu.PrefetchScalarGridSpec(
            num_scalar_prefetch=0,
            grid=grid,
            in_specs=[
                pl.BlockSpec((block_b, S, c_in), lambda i: (i, 0, 0)),  # x (f32)
                pl.BlockSpec((c_in, 3 * Hc), lambda i: (0, 0)),         # W_qkv
                pl.BlockSpec((Hc, c_in), lambda i: (0, 0)),             # W_o
                pl.BlockSpec((1, c_in), lambda i: (0, 0)),              # b_o
            ],
            out_specs=pl.BlockSpec((block_b, S, c_in), lambda i: (i, 0, 0)),
        ),
        compiler_params=pltpu.CompilerParams(
            dimension_semantics=("parallel",),
            vmem_limit_bytes=_vmem_limit_bytes(block_b, S, c_in, n_head, c),
        ),
    )(x, prep["wqkv"], prep["wo"], prep["bo"])
    return out


def reference_mha(x, params, *, n_head, c):
    """Pure-JAX f32 reference with the PyTorch module's semantics."""
    B, S, _ = x.shape
    q = x @ params["wq"]
    k = x @ params["wk"]
    v = x @ params["wv"]
    q = q.reshape(B, S, n_head, c).transpose(0, 2, 1, 3) / math.sqrt(c)
    k = k.reshape(B, S, n_head, c).transpose(0, 2, 1, 3)
    v = v.reshape(B, S, n_head, c).transpose(0, 2, 1, 3)
    a = jax.nn.softmax(jnp.einsum("bhqc,bhkc->bhqk", q, k), axis=-1)
    o = jnp.einsum("bhqk,bhkc->bhqc", a, v)
    o = o.transpose(0, 2, 1, 3).reshape(B, S, n_head * c)
    return o @ params["wo"] + params["bo"][0]


def init_params(key, c_in, c, n_head):
    """Deterministic init mimicking torch.nn.Linear defaults, weights (in, out)."""
    hc = n_head * c
    k1, k2, k3, k4, k5 = jax.random.split(key, 5)
    lim_in = 1.0 / math.sqrt(c_in)
    lim_hc = 1.0 / math.sqrt(hc)
    return {
        "wq": jax.random.uniform(k1, (c_in, hc), jnp.float32, -lim_in, lim_in),
        "wk": jax.random.uniform(k2, (c_in, hc), jnp.float32, -lim_in, lim_in),
        "wv": jax.random.uniform(k3, (c_in, hc), jnp.float32, -lim_in, lim_in),
        "wo": jax.random.uniform(k4, (hc, c_in), jnp.float32, -lim_hc, lim_hc),
        "bo": jax.random.uniform(k5, (1, c_in), jnp.float32, -lim_hc, lim_hc),
    }


if __name__ == "__main__":
    # Small shapes consistent with the module: c_in=32, c=8, N_head=4, seq=8.
    B, S, C_IN, C, N_HEAD = 2, 8, 32, 8, 4

    key = jax.random.PRNGKey(0)
    kx, kp = jax.random.split(key)
    x = jax.random.normal(kx, (B, S, C_IN), dtype=jnp.float32)
    params = init_params(kp, C_IN, C, N_HEAD)
    prep = prepare_params(params, n_head=N_HEAD, c=C)

    out = multi_head_attention(x, prep, n_head=N_HEAD, c=C)
    out = jax.block_until_ready(out)

    ref = reference_mha(x, params, n_head=N_HEAD, c=C)
    assert out.shape == (B, S, C_IN)
    # bf16 MXU operands + approx reciprocal -> loosen tolerance vs f32 reference.
    assert jnp.allclose(out, ref, atol=2e-2, rtol=2e-2), "mismatch vs JAX reference"

    print("KERNEL_OK")
</pallas_src>

<mosaic_0001>
module attributes {stable_mosaic.version = 11 : i64} {
  func.func @_mha_kernel(%arg0: i32, %arg1: memref<1x8x32xf32, #tpu.memory_space<vmem>>, %arg2: memref<32x96xbf16, #tpu.memory_space<vmem>>, %arg3: memref<32x32xbf16, #tpu.memory_space<vmem>>, %arg4: memref<1x32xf32, #tpu.memory_space<vmem>>, %arg5: memref<1x8x32xf32, #tpu.memory_space<vmem>>) attributes {dimension_semantics = [#tpu.dimension_semantics<parallel>], iteration_bounds = array<i64: 2>, scalar_prefetch = 0 : i64, scratch_operands = 0 : i64, tpu.core_type = #tpu.core_type<tc>, window_params = [{transform_indices = @transform_0, window_bounds = array<i64: 1, 8, 32>}, {pipeline_mode = #tpu.pipeline_mode<synchronous>, transform_indices = @transform_1, window_bounds = array<i64: 32, 96>}, {pipeline_mode = #tpu.pipeline_mode<synchronous>, transform_indices = @transform_2, window_bounds = array<i64: 32, 32>}, {pipeline_mode = #tpu.pipeline_mode<synchronous>, transform_indices = @transform_3, window_bounds = array<i64: 1, 32>}, {transform_indices = @transform_4, window_bounds = array<i64: 1, 8, 32>}]} {
    %c0 = arith.constant 0 : index
    %c0_0 = arith.constant 0 : index
    %c0_1 = arith.constant 0 : index
    %0 = vector.load %arg1[%c0, %c0_0, %c0_1] : memref<1x8x32xf32, #tpu.memory_space<vmem>>, vector<1x8x32xf32>
    %1 = vector.shape_cast %0 : vector<1x8x32xf32> to vector<8x32xf32>
    %2 = arith.truncf %1 : vector<8x32xf32> to vector<8x32xbf16>
    %c0_2 = arith.constant 0 : index
    %c0_3 = arith.constant 0 : index
    %3 = vector.load %arg2[%c0_2, %c0_3] : memref<32x96xbf16, #tpu.memory_space<vmem>>, vector<32x96xbf16>
    %cst = arith.constant dense<0.000000e+00> : vector<8x96xf32>
    %4 = tpu.matmul %2, %3, %cst {dimension_numbers = #tpu.dot_dimension_numbers<[1], [0], [0], [1], [0, 0, 1, 1], [], []>} : vector<8x32xbf16>, vector<32x96xbf16>, vector<8x96xf32> -> vector<8x96xf32>
    %5 = vector.extract_strided_slice %4 {offsets = [0, 0], sizes = [8, 8], strides = [1, 1]} : vector<8x96xf32> to vector<8x8xf32>
    %6 = vector.shape_cast %5 : vector<8x8xf32> to vector<1x1x8x8xf32>
    %7 = vector.extract_strided_slice %4 {offsets = [0, 8], sizes = [8, 8], strides = [1, 1]} : vector<8x96xf32> to vector<8x8xf32>
    %8 = vector.shape_cast %7 : vector<8x8xf32> to vector<1x1x8x8xf32>
    %9 = vector.extract_strided_slice %4 {offsets = [0, 16], sizes = [8, 8], strides = [1, 1]} : vector<8x96xf32> to vector<8x8xf32>
    %10 = vector.shape_cast %9 : vector<8x8xf32> to vector<1x1x8x8xf32>
    %11 = vector.extract_strided_slice %4 {offsets = [0, 24], sizes = [8, 8], strides = [1, 1]} : vector<8x96xf32> to vector<8x8xf32>
    %12 = vector.shape_cast %11 : vector<8x8xf32> to vector<1x1x8x8xf32>
    %13 = tpu.concatenate %6, %8, %10, %12 in 0 : vector<1x1x8x8xf32>, vector<1x1x8x8xf32>, vector<1x1x8x8xf32>, vector<1x1x8x8xf32> -> vector<4x1x8x8xf32>
    %14 = vector.shape_cast %13 : vector<4x1x8x8xf32> to vector<4x8x8xf32>
    %15 = arith.truncf %14 : vector<4x8x8xf32> to vector<4x8x8xbf16>
    %16 = vector.extract_strided_slice %4 {offsets = [0, 32], sizes = [8, 8], strides = [1, 1]} : vector<8x96xf32> to vector<8x8xf32>
    %17 = vector.shape_cast %16 : vector<8x8xf32> to vector<1x1x8x8xf32>
    %18 = vector.extract_strided_slice %4 {offsets = [0, 40], sizes = [8, 8], strides = [1, 1]} : vector<8x96xf32> to vector<8x8xf32>
    %19 = vector.shape_cast %18 : vector<8x8xf32> to vector<1x1x8x8xf32>
    %20 = vector.extract_strided_slice %4 {offsets = [0, 48], sizes = [8, 8], strides = [1, 1]} : vector<8x96xf32> to vector<8x8xf32>
    %21 = vector.shape_cast %20 : vector<8x8xf32> to vector<1x1x8x8xf32>
    %22 = vector.extract_strided_slice %4 {offsets = [0, 56], sizes = [8, 8], strides = [1, 1]} : vector<8x96xf32> to vector<8x8xf32>
    %23 = vector.shape_cast %22 : vector<8x8xf32> to vector<1x1x8x8xf32>
    %24 = tpu.concatenate %17, %19, %21, %23 in 0 : vector<1x1x8x8xf32>, vector<1x1x8x8xf32>, vector<1x1x8x8xf32>, vector<1x1x8x8xf32> -> vector<4x1x8x8xf32>
    %25 = vector.shape_cast %24 : vector<4x1x8x8xf32> to vector<4x8x8xf32>
    %26 = arith.truncf %25 : vector<4x8x8xf32> to vector<4x8x8xbf16>
    %27 = vector.extract_strided_slice %4 {offsets = [0, 64], sizes = [8, 8], strides = [1, 1]} : vector<8x96xf32> to vector<8x8xf32>
    %28 = vector.shape_cast %27 : vector<8x8xf32> to vector<1x1x8x8xf32>
    %29 = vector.extract_strided_slice %4 {offsets = [0, 72], sizes = [8, 8], strides = [1, 1]} : vector<8x96xf32> to vector<8x8xf32>
    %30 = vector.shape_cast %29 : vector<8x8xf32> to vector<1x1x8x8xf32>
    %31 = vector.extract_strided_slice %4 {offsets = [0, 80], sizes = [8, 8], strides = [1, 1]} : vector<8x96xf32> to vector<8x8xf32>
    %32 = vector.shape_cast %31 : vector<8x8xf32> to vector<1x1x8x8xf32>
    %33 = vector.extract_strided_slice %4 {offsets = [0, 88], sizes = [8, 8], strides = [1, 1]} : vector<8x96xf32> to vector<8x8xf32>
    %34 = vector.shape_cast %33 : vector<8x8xf32> to vector<1x1x8x8xf32>
    %35 = tpu.concatenate %28, %30, %32, %34 in 0 : vector<1x1x8x8xf32>, vector<1x1x8x8xf32>, vector<1x1x8x8xf32>, vector<1x1x8x8xf32> -> vector<4x1x8x8xf32>
    %36 = vector.shape_cast %35 : vector<4x1x8x8xf32> to vector<4x8x8xf32>
    %37 = arith.truncf %36 : vector<4x8x8xf32> to vector<4x8x8xbf16>
    "tpu.trace_start"() <{level = 10 : i32, message = "bqc,bkc->bqk"}> : () -> ()
    %cst_4 = arith.constant dense<0.000000e+00> : vector<4x8x8xf32>
    %38 = tpu.matmul %15, %26, %cst_4 {dimension_numbers = #tpu.dot_dimension_numbers<[2], [2], [1], [1], [0, 0, 0, 1, 1, 1], [0], [0]>} : vector<4x8x8xbf16>, vector<4x8x8xbf16>, vector<4x8x8xf32> -> vector<4x8x8xf32>
    "tpu.trace_stop"() : () -> ()
    %cst_5 = arith.constant dense<0xFF800000> : vector<4x8xf32>
    %39 = vector.multi_reduction <maximumf>, %38, %cst_5 [2] : vector<4x8x8xf32> to vector<4x8xf32>
    %40 = vector.shape_cast %39 : vector<4x8xf32> to vector<4x8x1xf32>
    %41 = vector.broadcast %40 : vector<4x8x1xf32> to vector<4x8x8xf32>
    %42 = arith.subf %38, %41 : vector<4x8x8xf32>
    %43 = math.exp %42 : vector<4x8x8xf32>
    %cst_6 = arith.constant dense<0.000000e+00> : vector<4x8xf32>
    %44 = vector.multi_reduction <add>, %43, %cst_6 [2] : vector<4x8x8xf32> to vector<4x8xf32>
    %45 = vector.shape_cast %44 : vector<4x8xf32> to vector<4x8x1xf32>
    %46 = tpu.reciprocal %45 {approx = true} : vector<4x8x1xf32> -> vector<4x8x1xf32>
    %47 = vector.broadcast %46 : vector<4x8x1xf32> to vector<4x8x8xf32>
    %48 = arith.mulf %43, %47 : vector<4x8x8xf32>
    %49 = arith.truncf %48 : vector<4x8x8xf32> to vector<4x8x8xbf16>
    "tpu.trace_start"() <{level = 10 : i32, message = "bqk,bkc->bqc"}> : () -> ()
    %cst_7 = arith.constant dense<0.000000e+00> : vector<4x8x8xf32>
    %50 = tpu.matmul %49, %37, %cst_7 {dimension_numbers = #tpu.dot_dimension_numbers<[2], [1], [1], [2], [0, 0, 0, 1, 1, 2], [0], [0]>} : vector<4x8x8xbf16>, vector<4x8x8xbf16>, vector<4x8x8xf32> -> vector<4x8x8xf32>
    "tpu.trace_stop"() : () -> ()
    %51 = vector.shape_cast %50 : vector<4x8x8xf32> to vector<4x1x8x8xf32>
    %52 = vector.extract_strided_slice %51 {offsets = [0, 0, 0, 0], sizes = [1, 1, 8, 8], strides = [1, 1, 1, 1]} : vector<4x1x8x8xf32> to vector<1x1x8x8xf32>
    %53 = vector.shape_cast %52 : vector<1x1x8x8xf32> to vector<1x8x8xf32>
    %54 = vector.extract_strided_slice %51 {offsets = [1, 0, 0, 0], sizes = [1, 1, 8, 8], strides = [1, 1, 1, 1]} : vector<4x1x8x8xf32> to vector<1x1x8x8xf32>
    %55 = vector.shape_cast %54 : vector<1x1x8x8xf32> to vector<1x8x8xf32>
    %56 = vector.extract_strided_slice %51 {offsets = [2, 0, 0, 0], sizes = [1, 1, 8, 8], strides = [1, 1, 1, 1]} : vector<4x1x8x8xf32> to vector<1x1x8x8xf32>
    %57 = vector.shape_cast %56 : vector<1x1x8x8xf32> to vector<1x8x8xf32>
    %58 = vector.extract_strided_slice %51 {offsets = [3, 0, 0, 0], sizes = [1, 1, 8, 8], strides = [1, 1, 1, 1]} : vector<4x1x8x8xf32> to vector<1x1x8x8xf32>
    %59 = vector.shape_cast %58 : vector<1x1x8x8xf32> to vector<1x8x8xf32>
    %60 = tpu.concatenate %53, %55, %57, %59 in 2 : vector<1x8x8xf32>, vector<1x8x8xf32>, vector<1x8x8xf32>, vector<1x8x8xf32> -> vector<1x8x32xf32>
    %61 = vector.shape_cast %60 : vector<1x8x32xf32> to vector<8x32xf32>
    %62 = arith.truncf %61 : vector<8x32xf32> to vector<8x32xbf16>
    %c0_8 = arith.constant 0 : index
    %c0_9 = arith.constant 0 : index
    %63 = vector.load %arg3[%c0_8, %c0_9] : memref<32x32xbf16, #tpu.memory_space<vmem>>, vector<32x32xbf16>
    %cst_10 = arith.constant dense<0.000000e+00> : vector<8x32xf32>
    %64 = tpu.matmul %62, %63, %cst_10 {dimension_numbers = #tpu.dot_dimension_numbers<[1], [0], [0], [1], [0, 0, 1, 1], [], []>} : vector<8x32xbf16>, vector<32x32xbf16>, vector<8x32xf32> -> vector<8x32xf32>
    %c0_11 = arith.constant 0 : index
    %c0_12 = arith.constant 0 : index
    %65 = vector.load %arg4[%c0_11, %c0_12] : memref<1x32xf32, #tpu.memory_space<vmem>>, vector<1x32xf32>
    %66 = vector.broadcast %65 : vector<1x32xf32> to vector<8x32xf32>
    %67 = arith.addf %64, %66 : vector<8x32xf32>
    %68 = vector.shape_cast %67 : vector<8x32xf32> to vector<1x8x32xf32>
    %c0_13 = arith.constant 0 : index
    %c0_14 = arith.constant 0 : index
    %c0_15 = arith.constant 0 : index
    %69 = vector.load %arg5[%c0_13, %c0_14, %c0_15] : memref<1x8x32xf32, #tpu.memory_space<vmem>>, vector<1x8x32xf32>
    tpu.vector_store %arg5[%c0_13, %c0_14, %c0_15], %68 {strides = array<i32>} : memref<1x8x32xf32, #tpu.memory_space<vmem>>, vector<1x8x32xf32>,
    return
  }
  func.func @transform_0(%arg0: i32) -> (i32, i32, i32) {
    %c0_i32 = arith.constant 0 : i32
    %c0_i32_0 = arith.constant 0 : i32
    %c0_i32_1 = arith.constant 0 : i32
    return %arg0, %c0_i32, %c0_i32_0 : i32, i32, i32
  }
  func.func @transform_1(%arg0: i32) -> (i32, i32) {
    %c0_i32 = arith.constant 0 : i32
    %c0_i32_0 = arith.constant 0 : i32
    %c0_i32_1 = arith.constant 0 : i32
    return %c0_i32, %c0_i32_0 : i32, i32
  }
  func.func @transform_2(%arg0: i32) -> (i32, i32) {
    %c0_i32 = arith.constant 0 : i32
    %c0_i32_0 = arith.constant 0 : i32
    %c0_i32_1 = arith.constant 0 : i32
    return %c0_i32, %c0_i32_0 : i32, i32
  }
  func.func @transform_3(%arg0: i32) -> (i32, i32) {
    %c0_i32 = arith.constant 0 : i32
    %c0_i32_0 = arith.constant 0 : i32
    %c0_i32_1 = arith.constant 0 : i32
    return %c0_i32, %c0_i32_0 : i32, i32
  }
  func.func @transform_4(%arg0: i32) -> (i32, i32, i32) {
    %c0_i32 = arith.constant 0 : i32
    %c0_i32_0 = arith.constant 0 : i32
    %c0_i32_1 = arith.constant 0 : i32
    return %arg0, %c0_i32, %c0_i32_0 : i32, i32, i32
  }
}

</mosaic_0001>

<bundles_post_ra>
// kernel: tpu_custom_call.1
= control target key start
LH: loop header
LB: loop body
LE: loop exit
PB: predicated region body
PF: predicated region fallthrough
CT: control target
= control target key end

     0   :  { %9 = vsyncpa [#allocation3], 0  ;;  %s1675_s0 = inlined_call_operand.hbm [shape: f32[2,8,32], index: 0, kind: input, shape index: {}]   ;;  %s1676_s1 = inlined_call_operand.hbm [shape: bf16[32,96], index: 1, kind: input, shape index: {}]   ;;  %s1677_s2 = inlined_call_operand.hbm [shape: bf16[32,32], index: 2, kind: input, shape index: {}]   ;;  %s1678_s3 = inlined_call_operand.vmem [shape: f32[1,32], index: 3, kind: input, shape index: {}]   ;;  %s1679_s4 = inlined_call_operand.hbm [shape: f32[2,8,32], index: 4, kind: output, shape index: {}]  }
   0x1   :  { %11 = vsyncpa [#allocation3 + $0x1], 0 }
   0x2   :  { %12 = vsyncpa [#allocation6], 0 }
   0x3   :  { %13 = vsyncpa [#allocation4], 0 }
   0x4   :  { %15 = vsyncpa [#allocation4 + $0x1], 0  ;;  %s1360_s15 = smov 0   ;;  %s1362_s16 = smov 0  }
   0x5   :  { %s1364_s17 = smov 0   ;;  %s1366_s18 = smov 0  }
   0x6 LB: > { %s1381_s19 = sadd.s32 4294967295, %s1317_s18   ;;  %s945_s20 = sadd.s32 4294967294, %s1317_s18   ;;  %s1317_s18 = sphi %s1366_s18, %s1699_s18   ;;  %s1313_s17 = sphi %s1364_s17, %s1698_s17   ;;  %s1309_s16 = sphi %s1362_s16, %s1697_s16   ;;  %s1305_s15 = sphi %s1360_s15, %s1696_s15  }
   0x7   : > { %p41_p0 = scmp.ne.s32.totalorder %s1309_s16, %s1305_s15  ;;  %p1680_p1 = scmp.eq.s32.totalorder %s1381_s19, 0 }
   0x8   : > { %p134_p3 = scmp.eq.s32.totalorder %s945_s20, 1  ;;  %p946_p5 = scmp.ge.s32.totalorder %s1317_s18, 1 }
   0x9   : > { %p1390_p4 = por %p1680_p1, %p41_p0  ;;  %p141_p7 = scmp.lt.s32.totalorder %s1317_s18, 3 }
   0xa   : > { %p1395_p6 = por %p134_p3, %p41_p0  ;;  %s1319_s24 = smov [#allocation5]  }
   0xb   : > { %s1683_s21 = scalar_select %p1390_p4, 1, 0 }
   0xc   : > { %s1684_s22 = scalar_select %p1395_p6, 1, 0 }
   0xd   : > { %p1400_p8 = pnand %p946_p5, %p141_p7  ;;  %s153_s25 = sshll.u32 %s1319_s24, 4  ;;  %s1404_s25 = int_to_ptr.vmem [resolvable:$true] %s153_s25 }
   0xe   : > { %s1320_s27 = smov [#allocation7]   ;;  %s1161_s5 = scalar_lea.hbm %s1676_s1, 256 }
   0xf   : > { %p1074_p9 = pneg %p1400_p8  ;;  %s166_s28 = sshll.u32 %s1320_s27, 4  ;;  %s1415_s28 = int_to_ptr.vmem [resolvable:$true] %s166_s28 }
  0x10   : > { %p1162_p12 = scmp.ne.s32.totalorder %s1676_s1, %s1161_s5  ;;  %p1168_p5 = scmp.lt.u32.totalorder %s1161_s5, %s1676_s1 }
  0x11   : > { %p1411_p11 = pnand %p1074_p9, %p1680_p1 }
  0x13   : > { %p1163_p13 = pneg %p1411_p11 }
  0x15   : > { %p1164_p0 = pnand %p1163_p13, %p1162_p12 }
  0x17   : > { %p1165_p3 = pneg %p1164_p0 }
  0x19   : > { %p1170_p7 = pnand %p1168_p5, %p1165_p3 }
  0x1b   : > { %1173 = shalt.err (!%p1170_p7)
}
  0x1c   : > { %s1174_s10 = scalar_lea.vmem %s1404_s25, 256  ;;  %p1182_p2 = scmp.lt.s32.totalorder %s1404_s25, %s1404_s25 }
  0x1d   : > { %p1175_p9 = scmp.ne.s32.totalorder %s1404_s25, %s1174_s10  ;;  %p1183_p12 = scmp.lt.s32.totalorder %s1174_s10, %s1174_s10 }
  0x1f   : > { %p1177_p10 = pnand %p1175_p9, %p1163_p13  ;;  %p1184_p0 = por %p1183_p12, %p1182_p2 }
  0x21   : > { %p1178_p1 = pneg %p1177_p10 }
  0x23   : > { %p1185_p6 = pnand %p1184_p0, %p1178_p1 }
  0x25   : > { %1188 = shalt.err (!%p1185_p6)
}
  0x26   : > { %s1321_s11 = smov 64   ;;  %s1322_s12 = smov 4  }
  0x27   : > { %1077 = dma.hbm_to_vmem [thread:$0]  (!%p1411_p11), %s1676_s1, 256, %s1404_s25, [#allocation6], %s1321_s11, %s1321_s11, %s1322_s12  }
  0x28   : > { %s1189_s27 = scalar_lea.hbm %s1677_s2, 256 }
  0x29   : > { %p1190_p2 = scmp.ne.s32.totalorder %s1677_s2, %s1189_s27  ;;  %p1196_p10 = scmp.lt.u32.totalorder %s1189_s27, %s1677_s2 }
  0x2b   : > { %p1192_p1 = pnand %p1190_p2, %p1163_p13 }
  0x2d   : > { %p1193_p6 = pneg %p1192_p1 }
  0x2f   : > { %p1198_p3 = pnand %p1196_p10, %p1193_p6 }
  0x31   : > { %1201 = shalt.err (!%p1198_p3)
}
  0x32   : > { %s1202_s25 = scalar_lea.vmem %s1415_s28, 256  ;;  %p1210_p12 = scmp.lt.s32.totalorder %s1415_s28, %s1415_s28 }
  0x33   : > { %p1203_p5 = scmp.ne.s32.totalorder %s1415_s28, %s1202_s25  ;;  %p1211_p0 = scmp.lt.s32.totalorder %s1202_s25, %s1202_s25 }
  0x35   : > { %p1205_p7 = pnand %p1203_p5, %p1163_p13  ;;  %p1212_p2 = por %p1211_p0, %p1210_p12 }
  0x37   : > { %p1206_p9 = pneg %p1205_p7 }
  0x39   : > { %p1213_p1 = pnand %p1212_p2, %p1206_p9 }
  0x3b   : > { %1216 = shalt.err (!%p1213_p1)
}
  0x3c   : > { %1080 = dma.hbm_to_vmem [thread:$0]  (!%p1411_p11), %s1677_s2, 256, %s1415_s28, [#allocation6], %s1321_s11, %s1321_s11, %s1322_s12  }
  0x3d   : > { %s1470_s9 = sadd.s32 1, %s1317_s18   ;;  %s28_s26 = sadd.s32 1, %s1313_s17 }
  0x3e   : > { %s25_s10 = ssub.s32 %s1317_s18, %s1470_s9  ;;  %p35_p13 = scmp.ne.s32.totalorder %s1313_s17, %s1309_s16 }
  0x3f   : > { %p26_p6 = scmp.eq.s32.totalorder %s25_s10, 0  ;;  %p36_p10 = scmp.eq.s32.totalorder %s1317_s18, 0 }
  0x40   : > { %p1687_p3 = scmp.eq.s32.totalorder %s1381_s19, 1  ;;  %p1091_p7 = scmp.lt.s32.totalorder %s1317_s18, 2 }
  0x41   : > { %s1486_s14 = scalar_select %p26_p6, %s1313_s17, %s28_s26  }
  0x42   : > { %p1480_p5 = por %p1687_p3, %p35_p13  ;;  %p37_p9 = por %p36_p10, %p35_p13 }
  0x43   : > { %s183_s20 = sand.u32 1, %s1313_s17   ;;  %s951_s28 = sshll.u32 %s1317_s18, 7 }
  0x44   : > { %s1688_s13 = scalar_select %p1480_p5, 1, 0 }
  0x45   : > { %s950_s24 = sshll.u32 %s183_s20, 3  ;;  %s1493_s27 = scalar_lea.hbm %s1675_s0, %s951_s28 }
  0x46   : > { %s187_s29 = scalar_lea.vmem [#allocation2], %s950_s24  ;;  %p1497_p11 = pnand %p1091_p7, %p37_p9 }
  0x47   : > { %s194_s30 = sshll.u32 %s187_s29, 4  ;;  %s184_s6 = scalar_lea.sflag [#allocation3], %s183_s20  ;;  %s1495_s30 = int_to_ptr.vmem [resolvable:$true] %s194_s30 }
  0x48   : > { %s1217_s25 = scalar_lea.hbm %s1493_s27, 128  ;;  %p1219_p0 = pneg %p1497_p11 }
  0x49   : > { %p1218_p12 = scmp.ne.s32.totalorder %s1493_s27, %s1217_s25  ;;  %s1222_s26 = scalar_lea.hbm %s1675_s0, 256 }
  0x4a   : > { %p1223_p13 = scmp.lt.u32.totalorder %s1493_s27, %s1675_s0  ;;  %p1224_p6 = scmp.lt.u32.totalorder %s1222_s26, %s1217_s25 }
  0x4b   : > { %p1220_p2 = pnand %p1219_p0, %p1218_p12  ;;  %p1226_p3 = scmp.lt.u32.totalorder %s1217_s25, %s1493_s27 }
  0x4c   : > { %p1225_p10 = por %p1224_p6, %p1223_p13 }
  0x4d   : > { %p1221_p1 = pneg %p1220_p2 }
  0x4e   : > { %p1227_p7 = por %p1226_p3, %p1225_p10 }
  0x50   : > { %p1228_p9 = pnand %p1227_p7, %p1221_p1 }
  0x52   : > { %1231 = shalt.err (!%p1228_p9)
}
  0x53   : > { %s1232_s20 = scalar_lea.vmem %s1495_s30, 128  ;;  %s1323_s28 = smov [#allocation2]  }
  0x54   : > { %p1233_p12 = scmp.ne.s32.totalorder %s1495_s30, %s1232_s20  ;;  %s1237_s11 = sshll.u32 %s1323_s28, 4  ;;  %s1238_s11 = int_to_ptr.vmem [resolvable:$false] %s1237_s11 }
  0x55   : > { %s1239_s12 = scalar_lea.vmem %s1238_s11, 256  ;;  %p1240_p4 = scmp.lt.s32.totalorder %s1495_s30, %s1238_s11 }
  0x56   : > { %p1235_p2 = pnand %p1233_p12, %p1219_p0  ;;  %p1241_p13 = scmp.lt.s32.totalorder %s1239_s12, %s1232_s20 }
  0x58   : > { %p1236_p5 = pneg %p1235_p2  ;;  %p1242_p6 = por %p1241_p13, %p1240_p4 }
  0x5a   : > { %p1243_p10 = pnand %p1242_p6, %p1236_p5 }
  0x5c   : > { %1246 = shalt.err (!%p1243_p10)
}
  0x5d   : > { %1084 = dma.hbm_to_vmem [thread:$0]  (!%p1497_p11), %s1493_s27, 128, %s1495_s30, %s184_s6  }
  0x5e   : > { %203 = sbr.rel (%p1400_p8) target bundleno = 1661 (0x67d), region = 36  ;;  %s1529_s29 = sand.u32 (!%p1400_p8), 1, %s1309_s16  }
  0x5f   : > { %s953_s25 = sshll.u32 (!%p1400_p8), %s1529_s29, 3  ;;  %s206_s7 = scalar_lea.sflag (!%p1400_p8), [#allocation3], %s1529_s29 }
  0x60   : > { %s209_s8 = scalar_lea.vmem (!%p1400_p8), [#allocation2], %s953_s25  ;;  %p1690_p4 = scmp.ne.s32.totalorder (!%p1400_p8), %s1683_s21, 0 }
  0x65   : > { %1292 = dma.done.wait (%p1690_p4), %s206_s7, 128  }
  0x66   : > { %1294 = vsyncadd (%p1690_p4), %s206_s7, 4294967168  ;;  %p1691_p5 = scmp.eq.s32.totalorder %s1381_s19, 0 }
  0x68   : > { %1296 = dma.done.wait (%p1691_p5), [#allocation6], 512   ;;  %p1692_p8 = pmov %p1691_p5 }
  0x69   : > { %v1324_v0 = vmov 0.0   ;;  %vm1325_vm0 = vmmov 0   ;;  %v1141_v1 = vld [vmem:[#allocation5] sm:$0xff]   ;;  %v1142_v2 = vld [vmem:[#allocation5 + $0x8] sm:$0xff]   ;;  %v243_v3 = vld [vmem:[%s209_s8] sm:$0xff]  ;;  %vm261_vm1 = vcmask 261120  }
  0x6a   : > { %1298 = vsyncadd (%p1692_p8), [#allocation6], 4294966784  ;;  %998 = vmatprep.subr.bf16.mxu0 %v1324_v0  ;;  %1002 = vmatprep.mubr.msk.bf16.mxu0 %vm1325_vm0, %v1324_v0  ;;  %v244_v4 = vpack.c.bf16 %v243_v3, %v243_v3  ;;  %s1326_s21 = smov 104   ;;  %s1327_s23 = smov 120   ;;  %vm322_vm2 = vcmask 64512   ;;  %vm569_vm3 = vcmask 1043456  }
  0x6b   : > { %1006 = vmatprep.subr.bf16.mxu1 %v1324_v0  ;;  %1008 = vmatprep.mubr.msk.bf16.mxu1 %vm1325_vm0, %v1324_v0  ;;  %s1328_s27 = smov 112   ;;  %s1329_s30 = smov 96   ;;  %vm770_vm4 = vcmask 130048   ;;  %vm772_vm5 = vcmask 195584  }
  0x6c   : > { %999 = vmatpush3.bf16.msra.mxu0 %v1141_v1  ;;  %s1330_s5 = smov 64   ;;  %s1331_s6 = smov 8  }
  0x6d   : > { %1000 = vmatprep.subr.bf16.mxu0 %v1324_v0  ;;  %s1332_s26 = smov 16   ;;  %s1333_s10 = smov 24  }
  0x6e   : > { %s973_s28 = sshll.u32 %s1381_s19, 7  ;;  %s241_s11 = scalar_lea.vmem [#allocation8], %s953_s25 }
  0x6f   : > { %s856_s12 = sshll.u32 %s241_s11, 4  ;;  %s843_s19 = scalar_lea.sflag [#allocation4], %s1529_s29  ;;  %s1632_s12 = int_to_ptr.vmem [resolvable:$true] %s856_s12 }
  0x70   : > { %1001 = vmatpush3.bf16.msra.mxu0 %v1142_v2  ;;  %s1247_s25 = scalar_lea.vmem %s1632_s12, 128  ;;  %p1693_p0 = scmp.ne.s32.totalorder %s1688_s13, 0 }
  0x71   : > { %1012 = vmatprep.subr.bf16.mxu0 %v1324_v0  ;;  %p1248_p11 = scmp.ne.s32.totalorder %s1632_s12, %s1247_s25 }
  0x73   : > { %1003 = vmatmul.mubr.msk.bf16.vlgmr.msra.gmra.mrb[0].mxu0 %vm261_vm1, %v244_v4  ;;  %p1249_p1 = pnand %p1248_p11, %p1693_p0 }
  0x74   : > { %1014 = vmatprep.mubr.msk.bf16.mxu0 %vm1325_vm0, %v1324_v0 }
  0x75   : > { %p1250_p3 = pneg %p1249_p1 }
 0x146   : > { %v299_v5 = vpop.f32.mrb[0].mxu0 }
 0x147   : > { %312 = vrot.lane.b32.xlu1 %v299_v5, %s1326_s21  ;;  %306 = vrot.lane.b32.xlu0 %v299_v5, %s1327_s23  ;;  %v1004_v6 = vpop.f32.mrb[1].mxu0  ;;  %v1554_v9 = vpack.c.bf16 %v299_v5, %v299_v5  ;;  %s1630_s21 = scalar_lea.hbm %s1679_s4, %s973_s28  ;;  %s1334_s23 = smov [#allocation8]  }
 0x148   : > { %v302_v7 = vpop.f32.mrb[2].mxu0 }
 0x149   : > { %v1005_v8 = vpop.f32.mrb[3].mxu0 }
 0x14b   : > { %309 = vrot.lane.b32.xlu0 %v299_v5, %s1328_s27  ;;  %320 = vrot.lane.b32.xlu1 %v1554_v9, %s1329_s30  ;;  %s1251_s27 = sshll.u32 %s1334_s23, 4  ;;  %s1252_s27 = int_to_ptr.vmem [resolvable:$false] %s1251_s27 }
 0x14c   : > { %p1254_p7 = scmp.lt.s32.totalorder %s1632_s12, %s1252_s27 }
 0x1b9   : > { %v313_v10 = vpop.permute.xlu1 %312  ;;  %v307_v11 = vpop.permute.xlu0 %306 }
 0x1ba   : > { %v316_v12 = vpack.c.bf16 %v307_v11, %v307_v11  ;;  %v1557_v15 = vpack.c.bf16 %v313_v10, %v313_v10 }
 0x1bc   : > { %370 = vrot.lane.b32.xlu0 %v316_v12, %s1329_s30 }
 0x1bd   : > { %v310_v13 = vpop.permute.xlu0 %309  ;;  %v321_v14 = vpop.permute.xlu1 %320 }
 0x1be   : > { %v1559_v16 = vpack.c.bf16 %v310_v13, %v310_v13  ;;  %v327_v17 = vsel %vm322_vm2, %v321_v14, 0 }
 0x1bf   : > { %1007 = vmatpush3.bf16.xpose.msra.mxu1 %v327_v17 }
 0x1c0   : > { %468 = vrot.lane.b32.xlu0 %v1557_v15, %s1329_s30  ;;  %419 = vrot.lane.b32.xlu1 %v1559_v16, %s1329_s30  ;;  %s1253_s30 = scalar_lea.vmem %s1252_s27, 256 }
 0x1c1   : > { %1018 = vmatprep.subr.bf16.mxu1 %v1324_v0  ;;  %p1255_p9 = scmp.lt.s32.totalorder %s1253_s30, %s1247_s25 }
 0x1c3   : > { %p1256_p12 = por %p1255_p9, %p1254_p7 }
 0x1c5   : > { %p1257_p2 = pnand %p1256_p12, %p1250_p3 }
 0x1c6   : > { %1009 = vmatmul.mubr.msk.bf16.vlgmr.msra.gmra.mrb[0].mxu1 %vm322_vm2, %v1554_v9 }
 0x1c7   : > { %1020 = vmatprep.mubr.msk.bf16.mxu1 %vm1325_vm0, %v1324_v0 }
 0x22e   : > { %v371_v18 = vpop.permute.xlu0 %370 }
 0x22f   : > { %v376_v19 = vsel %vm322_vm2, %v371_v18, 0 }
 0x230   : > { %1013 = vmatpush3.bf16.xpose.msra.mxu0 %v376_v19 }
 0x231   : > { %1024 = vmatprep.subr.bf16.mxu0 %v1324_v0 }
 0x232   : > { %v420_v20 = vpop.permute.xlu1 %419  ;;  %v469_v22 = vpop.permute.xlu0 %468 }
 0x233   : > { %v425_v21 = vsel %vm322_vm2, %v420_v20, 0  ;;  %v474_v23 = vsel %vm322_vm2, %v469_v22, 0 }
 0x234   : > { %1019 = vmatpush3.bf16.xpose.msra.mxu1 %v425_v21 }
 0x235   : > { %1030 = vmatprep.subr.bf16.mxu1 %v1324_v0 }
 0x237   : > { %1015 = vmatmul.mubr.msk.bf16.vlgmr.msra.gmra.mrb[4].mxu0 %vm322_vm2, %v316_v12 }
 0x238   : > { %1025 = vmatpush3.bf16.xpose.msra.mxu0 %v474_v23  ;;  %1026 = vmatprep.mubr.msk.bf16.mxu0 %vm1325_vm0, %v1324_v0 }
 0x239   : > { %1036 = vmatprep.subr.bf16.mxu0 %v1324_v0 }
 0x23b   : > { %1021 = vmatmul.mubr.msk.bf16.vlgmr.msra.gmra.mrb[4].mxu1 %vm322_vm2, %v1559_v16 }
 0x23c   : > { %1032 = vmatprep.mubr.msk.bf16.mxu1 %vm1325_vm0, %v1324_v0 }
 0x23f   : > { %1027 = vmatmul.mubr.msk.bf16.vlgmr.msra.gmra.mrb[8].mxu0 %vm322_vm2, %v1557_v15 }
 0x240   : > { %1038 = vmatprep.mubr.msk.bf16.mxu0 %vm1325_vm0, %v1324_v0 }
 0x299   : > { %v363_v24 = vpop.f32.mrb[0].mxu1 }
 0x29a   : > { %v1010_v25 = vpop.f32.mrb[1].mxu1  ;;  %v516_v26 = vsel %vm322_vm2, %v363_v24, -inf }
 0x29b   : > { %517 = vmax.xlane.f32.xlu1 %v516_v26  ;;  %v366_v27 = vpop.f32.mrb[2].mxu1 }
 0x29c   : > { %v1011_v28 = vpop.f32.mrb[3].mxu1 }
 0x30a   : > { %v412_v29 = vpop.f32.mrb[4].mxu0 }
 0x30b   : > { %v1016_v30 = vpop.f32.mrb[5].mxu0  ;;  %v519_v31 = vsel %vm322_vm2, %v412_v29, -inf }
 0x30c   : > { %520 = vmax.xlane.f32.xlu0 %v519_v31  ;;  %v415_v32 = vpop.f32.mrb[6].mxu0  ;;  %v1144_v30 = vld [vmem:[#allocation7 + $0x8] sm:$0xff]  }
 0x30d   : > { %v1017_v33 = vpop.f32.mrb[7].mxu0 }
 0x30e   : > { %v461_v34 = vpop.f32.mrb[4].mxu1 }
 0x30f   : > { %v1022_v35 = vpop.f32.mrb[5].mxu1  ;;  %v522_v36 = vsel %vm322_vm2, %v461_v34, -inf }
 0x310   : > { %v464_v37 = vpop.f32.mrb[6].mxu1  ;;  %523 = vmax.xlane.f32.xlu0 %v522_v36 }
 0x311   : > { %v1023_v38 = vpop.f32.mrb[7].mxu1 }
 0x312   : > { %v510_v39 = vpop.f32.mrb[8].mxu0 }
 0x313   : > { %v1028_v40 = vpop.f32.mrb[9].mxu0  ;;  %v525_v41 = vsel %vm322_vm2, %v510_v39, -inf }
 0x314   : > { %526 = vmax.xlane.f32.xlu1 %v525_v41  ;;  %v513_v42 = vpop.f32.mrb[10].mxu0 }
 0x315   : > { %v1029_v43 = vpop.f32.mrb[11].mxu0 }
 0x325   : > { %613 = vrot.lane.b32.xlu1 %v316_v12, %s1330_s5 }
 0x326   : > { %564 = vrot.lane.b32.xlu0 %v1554_v9, %s1330_s5 }
 0x328   : > { %v518_v44 = vpop.xlane.xlu1 %517 }
 0x329   : > { %v528_v45 = vsub.f32 %v363_v24, %v518_v44 }
 0x32b   : > { %v532_v46 = vmul.f32 1.442695, %v528_v45 }
 0x32d   : > { %1145 = vpow2.f32 %v532_v46 }
 0x337   : > { %v1146_v47 = vpop.eup %1145 }
 0x338   : > { %v540_v48 = vsel %vm322_vm2, %v1146_v47, 0.0 }
 0x345   : > { %541 = vadd.xlane.f32.xlu0 %v540_v48 }
 0x399   : > { %v521_v49 = vpop.xlane.xlu0 %520 }
 0x39a   : > { %v529_v50 = vsub.f32 %v412_v29, %v521_v49  ;;  %v1143_v29 = vld [vmem:[#allocation7] sm:$0xff]  }
 0x39b   : > { %v968_v49 = vld [vmem:[%s1678_s3] ss:$0 sm:$0xff] }
 0x39c   : > { %v534_v51 = vmul.f32 1.442695, %v529_v50 }
 0x39d   : > { %v524_v52 = vpop.xlane.xlu0 %523 }
 0x39e   : > { %1147 = vpow2.f32 %v534_v51  ;;  %v530_v53 = vsub.f32 %v461_v34, %v524_v52 }
 0x3a0   : > { %v536_v54 = vmul.f32 1.442695, %v530_v53 }
 0x3a1   : > { %v565_v55 = vpop.permute.xlu0 %564  ;;  %v527_v56 = vpop.xlane.xlu1 %526 }
 0x3a2   : > { %1149 = vpow2.f32 %v536_v54  ;;  %v571_v57 = vsel %vm569_vm3, %v565_v55, 0  ;;  %v531_v58 = vsub.f32 %v510_v39, %v527_v56 }
 0x3a3   : > { %1031 = vmatpush3.bf16.msra.mxu1 %v571_v57 }
 0x3a4   : > { %v538_v59 = vmul.f32 1.442695, %v531_v58  ;;  %1042 = vmatprep.subr.bf16.mxu1 %v1324_v0 }
 0x3a5   : > { %v614_v60 = vpop.permute.xlu1 %613 }
 0x3a6   : > { %1151 = vpow2.f32 %v538_v59  ;;  %v619_v61 = vsel %vm569_vm3, %v614_v60, 0 }
 0x3a7   : > { %1037 = vmatpush3.bf16.msra.mxu0 %v619_v61 }
 0x3a8   : > { %v1148_v62 = vpop.eup %1147  ;;  %1048 = vmatprep.subr.bf16.mxu0 %v1324_v0 }
 0x3a9   : > { %v543_v63 = vsel %vm322_vm2, %v1148_v62, 0.0 }
 0x3aa   : > { %544 = vadd.xlane.f32.xlu1 %v543_v63 }
 0x3ac   : > { %v1150_v1 = vpop.eup %1149 }
 0x3ad   : > { %v546_v2 = vsel %vm322_vm2, %v1150_v1, 0.0 }
 0x3ae   : > { %547 = vadd.xlane.f32.xlu0 %v546_v2 }
 0x3b0   : > { %v1152_v3 = vpop.eup %1151 }
 0x3b1   : > { %v549_v4 = vsel %vm322_vm2, %v1152_v3, 0.0 }
 0x3b2   : > { %550 = vadd.xlane.f32.xlu1 %v549_v4 }
 0x3c3   : > { %661 = vrot.lane.b32.xlu1 %v1559_v16, %s1330_s5 }
 0x3c4   : > { %709 = vrot.lane.b32.xlu0 %v1557_v15, %s1330_s5 }
 0x3d2   : > { %v542_v5 = vpop.xlane.xlu0 %541 }
 0x3d3   : > { %1153 = vrcp.f32 %v542_v5 }
 0x3dd   : > { %v1154_v6 = vpop.eup %1153 }
 0x3de   : > { %v556_v7 = vmul.f32 %v1154_v6, %v1146_v47 }
 0x3e0   : > { %v560_v8 = vpack.c.bf16 %v556_v7, %v556_v7 }
 0x3e2   : > { %1033 = vmatmul.mubr.msk.bf16.vlgmr.msra.gmra.mrb[8].mxu1 %vm322_vm2, %v560_v8 }
 0x3e3   : > { %1044 = vmatprep.mubr.msk.bf16.mxu1 %vm1325_vm0, %v1324_v0 }
 0x437   : > { %v545_v9 = vpop.xlane.xlu1 %544 }
 0x438   : > { %1155 = vrcp.f32 %v545_v9 }
 0x43b   : > { %v548_v10 = vpop.xlane.xlu0 %547 }
 0x43c   : > { %1157 = vrcp.f32 %v548_v10 }
 0x43f   : > { %v551_v11 = vpop.xlane.xlu1 %550  ;;  %v710_v15 = vpop.permute.xlu0 %709 }
 0x440   : > { %1159 = vrcp.f32 %v551_v11  ;;  %v715_v20 = vsel %vm569_vm3, %v710_v15, 0 }
 0x442   : > { %v1156_v12 = vpop.eup %1155 }
 0x443   : > { %v557_v13 = vmul.f32 %v1156_v12, %v1148_v62  ;;  %v662_v14 = vpop.permute.xlu1 %661 }
 0x444   : > { %v667_v16 = vsel %vm569_vm3, %v662_v14, 0 }
 0x445   : > { %1043 = vmatpush3.bf16.msra.mxu1 %v667_v16  ;;  %v561_v17 = vpack.c.bf16 %v557_v13, %v557_v13 }
 0x446   : > { %v1158_v18 = vpop.eup %1157  ;;  %1054 = vmatprep.subr.bf16.mxu1 %v1324_v0 }
 0x447   : > { %v558_v19 = vmul.f32 %v1158_v18, %v1150_v1  ;;  %1039 = vmatmul.mubr.msk.bf16.vlgmr.msra.gmra.mrb[12].mxu0 %vm322_vm2, %v561_v17 }
 0x448   : > { %1049 = vmatpush3.bf16.msra.mxu0 %v715_v20  ;;  %1050 = vmatprep.mubr.msk.bf16.mxu0 %vm1325_vm0, %v1324_v0 }
 0x449   : > { %v562_v21 = vpack.c.bf16 %v558_v19, %v558_v19 }
 0x44a   : > { %v1160_v22 = vpop.eup %1159 }
 0x44b   : > { %v559_v23 = vmul.f32 %v1160_v22, %v1152_v3  ;;  %1045 = vmatmul.mubr.msk.bf16.vlgmr.msra.gmra.mrb[12].mxu1 %vm322_vm2, %v562_v21 }
 0x44c   : > { %1058 = vmatprep.mubr.msk.bf16.mxu1 %vm1325_vm0, %v1324_v0  ;;  %1055 = vmatpush3.bf16.msra.mxu1 %v1143_v29 }
 0x44d   : > { %v563_v24 = vpack.c.bf16 %v559_v23, %v559_v23  ;;  %1056 = vmatprep.subr.bf16.mxu1 %v1324_v0 }
 0x44f   : > { %1051 = vmatmul.mubr.msk.bf16.vlgmr.msra.gmra.mrb[16].mxu0 %vm322_vm2, %v563_v24 }
 0x450   : > { %1057 = vmatpush3.bf16.msra.mxu1 %v1144_v30 }
 0x4b5   : > { %v607_v25 = vpop.f32.mrb[8].mxu1 }
 0x4b6   : > { %v1034_v26 = vpop.f32.mrb[9].mxu1 }
 0x4b7   : > { %v610_v27 = vpop.f32.mrb[10].mxu1 }
 0x4b8   : > { %v1035_v28 = vpop.f32.mrb[11].mxu1 }
 0x51a   : > { %v655_v31 = vpop.f32.mrb[12].mxu0 }
 0x51b   : > { %758 = vrot.lane.b32.xlu1 %v655_v31, %s1331_s6  ;;  %v1040_v32 = vpop.f32.mrb[13].mxu0 }
 0x51c   : > { %v658_v33 = vpop.f32.mrb[14].mxu0 }
 0x51d   : > { %v1041_v34 = vpop.f32.mrb[15].mxu0 }
 0x51e   : > { %v703_v35 = vpop.f32.mrb[12].mxu1 }
 0x51f   : > { %762 = vrot.lane.b32.xlu0 %v703_v35, %s1332_s26  ;;  %v1046_v36 = vpop.f32.mrb[13].mxu1 }
 0x520   : > { %v706_v37 = vpop.f32.mrb[14].mxu1 }
 0x521   : > { %v1047_v38 = vpop.f32.mrb[15].mxu1 }
 0x522   : > { %v751_v39 = vpop.f32.mrb[16].mxu0 }
 0x523   : > { %766 = vrot.lane.b32.xlu1 %v751_v39, %s1333_s10  ;;  %v1052_v0 = vpop.f32.mrb[17].mxu0 }
 0x524   : > { %v754_v40 = vpop.f32.mrb[18].mxu0 }
 0x525   : > { %v1053_v41 = vpop.f32.mrb[19].mxu0 }
 0x58d   : > { %v759_v42 = vpop.permute.xlu1 %758 }
 0x58e   : > { %v769_v44 = vsel %vm322_vm2, %v607_v25, %v759_v42 }
 0x591   : > { %v763_v43 = vpop.permute.xlu0 %762 }
 0x592   : > { %v771_v45 = vsel %vm770_vm4, %v769_v44, %v763_v43 }
 0x595   : > { %v767_v46 = vpop.permute.xlu1 %766 }
 0x596   : > { %v773_v47 = vsel %vm772_vm5, %v771_v45, %v767_v46 }
 0x597   : > { %v774_v48 = vpack.c.bf16 %v773_v47, %v773_v47 }
 0x599   : > { %1059 = vmatmul.mubr.msk.bf16.vlgmr.msra.gmra.mrb[16].mxu1 %vm261_vm1, %v774_v48 }
 0x66c   : > { %v835_v50 = vpop.f32.mrb[16].mxu1 }
 0x66d   : > { %v836_v51 = vadd.f32 %v968_v49, %v835_v50  ;;  %v1060_v52 = vpop.f32.mrb[17].mxu1 }
 0x66e   : > { %v838_v53 = vpop.f32.mrb[18].mxu1 }
 0x66f   : > { %v1061_v54 = vpop.f32.mrb[19].mxu1  ;;  %841 = vst.msk [vmem:[%s241_s11] sm:$0xff] %vm261_vm1, %v836_v51 }
 0x670   : > { %1260 = shalt.err (!%p1257_p2)
}
 0x671   : > { %s1261_s29 = scalar_lea.hbm %s1630_s21, 128  ;;  %s1265_s26 = scalar_lea.hbm %s1679_s4, 256 }
 0x672   : > { %p1262_p13 = scmp.ne.s32.totalorder %s1630_s21, %s1261_s29  ;;  %p1266_p4 = scmp.lt.u32.totalorder %s1630_s21, %s1679_s4 }
 0x673   : > { %p1267_p5 = scmp.lt.u32.totalorder %s1265_s26, %s1261_s29  ;;  %p1269_p11 = scmp.lt.u32.totalorder %s1261_s29, %s1630_s21 }
 0x674   : > { %p1263_p6 = pnand %p1262_p13, %p1693_p0 }
 0x675   : > { %p1268_p8 = por %p1267_p5, %p1266_p4 }
 0x676   : > { %p1264_p10 = pneg %p1263_p6 }
 0x677   : > { %p1270_p1 = por %p1269_p11, %p1268_p8 }
 0x679   : > { %p1271_p3 = pnand %p1270_p1, %p1264_p10 }
 0x67b   : > { %1274 = shalt.err (!%p1271_p3)
}
 0x67c   : > { %1072 = dma.vmem_to_hbm [thread:$0]  (%p1693_p0), %s1632_s12, 128, %s1630_s21, %s843_s19  }
 0x67d PF: > { %s868_s20 = sand.u32 1, %s1305_s15   ;;  %p1694_p7 = scmp.ne.s32.totalorder %s1684_s22, 0 }
 0x67e   : > { %p1695_p9 = scmp.ge.s32.totalorder %s1317_s18, 2  ;;  %s869_s28 = scalar_lea.sflag [#allocation4], %s868_s20 }
 0x680   : > { %p1086_p12 = pnand %p1695_p9, %p1694_p7 }
 0x682   : > { %1300 = dma.done.wait (!%p1086_p12), %s869_s28, 128  }
 0x683   : > { %1302 = vsyncadd (!%p1086_p12), %s869_s28, 4294967168  ;;  %p18_p2 = scmp.ge.s32.totalorder %s1470_s9, 4   ;;  %s1696_s15 = smov %s1309_s16 }
 0x684   : > { %s1697_s16 = smov %s1313_s17  ;;  %s1698_s17 = smov %s1486_s14 }
 0x685   : > { %s1699_s18 = smov %s1470_s9  ;;  %20 = sbr.rel (!%p18_p2) target bundleno = 6 (0x6), region = 89 }
 0x68c   :  { %874 = vsyncpa [#allocation3], 1 }
 0x68d   :  { %876 = vsyncpa [#allocation3 + $0x1], 1 }
 0x68e   :  { %877 = vsyncpa [#allocation6], 1 }
 0x68f   :  { %878 = vsyncpa [#allocation4], 1 }
 0x690   :  { %880 = vsyncpa [#allocation4 + $0x1], 1 }

</bundles_post_ra>
